<compile_context>
chip_gen: v7x
topology: tpu7x:2x2x1
jax: 0.10.0
libtpu: 0.0.40
codegen_flags: <defaults>
</compile_context>

<pallas_src>
import jax
import jax.numpy as jnp
from jax.experimental import pallas as pl
from jax.experimental.pallas import tpu as pltpu


_SQRT_HALF = 0.7071067811865476


def _ffn_kernel(x_ref, w1_ref, b1_ref, w2_ref, b2_ref, o_ref, acc_ref):
    # x_ref: (TM, dim), w1_ref: (dim, TH), b1_ref: (1, TH),
    # w2_ref: (TH, dim), b2_ref: (1, dim), o_ref: (TM, dim), acc_ref: (TM, dim) f32
    k = pl.program_id(1)

    # First linear, partial over this hidden tile: native-dtype operands, f32 accumulate.
    h = jnp.dot(x_ref[...], w1_ref[...], preferred_element_type=jnp.float32)
    h = h + b1_ref[...].astype(jnp.float32)

    # Exact (erf-based) GELU in f32, matching torch.nn.GELU() default.
    h = 0.5 * h * (1.0 + jax.lax.erf(h * _SQRT_HALF))

    # Second linear, partial: (TM, TH) @ (TH, dim) in f32.
    partial = jnp.dot(h.astype(w2_ref.dtype), w2_ref[...],
                      preferred_element_type=jnp.float32)

    # First k step writes the accumulator directly — skips the zero-init + RMW pass.
    @pl.when(k == 0)
    def _():
        acc_ref[...] = partial

    @pl.when(k > 0)
    def _():
        acc_ref[...] += partial

    # Epilogue: add b2 once, cast, store.
    @pl.when(k == pl.num_programs(1) - 1)
    def _():
        o_ref[...] = (acc_ref[...] + b2_ref[...].astype(jnp.float32)).astype(o_ref.dtype)


def _vmem_capacity_bytes():
    """Per-core VMEM capacity; conservative (v7x, 64 MiB) fallback if the query fails."""
    try:
        cap = getattr(pltpu.get_tpu_info(), "vmem_capacity_bytes", None)
        if cap:
            return int(cap)
    except Exception:
        pass
    return 64 << 20


def _working_set_bytes(tm, th, dim, itemsize):
    # Double-buffered input/output tiles + resident f32 accumulator.
    in_tiles = tm * dim + dim * th + th + th * dim + dim
    out_tile = tm * dim
    return 2 * (in_tiles + out_tile) * itemsize + tm * dim * 4


_TM_CANDS = (768, 512, 384, 256, 128, 64, 32, 16, 8)
_TH_CANDS = (2048, 1024, 512, 256, 128)


def _select_tiles(rows, dim, hidden, itemsize, budget):
    """Pick (tm, th): prefer large tm first (weight re-streaming ~ 1/tm), then a fat
    hidden tile (fewer k steps / accumulator passes), within the VMEM budget."""
    th_cands = [t for t in _TH_CANDS if t <= hidden and hidden % t == 0]
    if hidden not in th_cands:
        th_cands = [hidden] + th_cands        # full hidden extent is always legal

    tm_cands = [t for t in _TM_CANDS if t <= rows]
    if rows <= _TM_CANDS[0] and rows not in tm_cands:
        tm_cands = [rows] + tm_cands          # single full-extent row tile (no ragged block)
    if not tm_cands:
        tm_cands = [rows]

    # Pass 1: keep the hidden tile reasonably fat (>=512 or full hidden).
    for tm in tm_cands:
        for th in th_cands:
            if th < 512 and th != hidden:
                continue
            if _working_set_bytes(tm, th, dim, itemsize) <= budget:
                return tm, th
    # Pass 2: anything that fits.
    for tm in tm_cands:
        for th in th_cands:
            if _working_set_bytes(tm, th, dim, itemsize) <= budget:
                return tm, th
    # Fallback: smallest candidates (tiny shapes always land here harmlessly).
    return tm_cands[-1], th_cands[-1]


def feed_forward(x, w1, b1, w2, b2):
    """x: (B, S, dim); w1: (dim, hidden); b1: (hidden,); w2: (hidden, dim); b2: (dim,)."""
    B, S, dim = x.shape
    hidden = w1.shape[1]
    rows = B * S
    itemsize = jnp.dtype(x.dtype).itemsize

    vmem_cap = _vmem_capacity_bytes()
    tm, th = _select_tiles(rows, dim, hidden, itemsize, budget=int(0.8 * vmem_cap))

    ws = _working_set_bytes(tm, th, dim, itemsize)
    vmem_limit = int(min(max(ws + (8 << 20), 32 << 20), int(0.9 * vmem_cap)))

    # Free reshapes; no pad / slice copies. Ragged last row block (rows % tm != 0) is
    # handled by Pallas: rows are independent and OOB output writes are masked.
    x2d = x.reshape(rows, dim)
    b1_2d = b1.reshape(1, hidden)
    b2_2d = b2.reshape(1, dim)

    grid = (pl.cdiv(rows, tm), hidden // th)

    out2d = pl.pallas_call(
        _ffn_kernel,
        out_shape=jax.ShapeDtypeStruct((rows, dim), x.dtype),
        grid_spec=pltpu.PrefetchScalarGridSpec(
            num_scalar_prefetch=0,
            grid=grid,
            in_specs=[
                pl.BlockSpec((tm, dim), lambda i, k: (i, 0)),   # x row tile
                pl.BlockSpec((dim, th), lambda i, k: (0, k)),   # W1 hidden tile
                pl.BlockSpec((1, th),   lambda i, k: (0, k)),   # b1 hidden tile
                pl.BlockSpec((th, dim), lambda i, k: (k, 0)),   # W2 hidden tile
                pl.BlockSpec((1, dim),  lambda i, k: (0, 0)),   # b2 (full)
            ],
            out_specs=pl.BlockSpec((tm, dim), lambda i, k: (i, 0)),
            scratch_shapes=[pltpu.VMEM((tm, dim), jnp.float32)],
        ),
        compiler_params=pltpu.CompilerParams(
            # Row tiles split across TensorCores (megacore); tm is large so each core
            # owns only a few tiles and weight HBM traffic is not needlessly duplicated.
            dimension_semantics=("parallel", "arbitrary"),
            vmem_limit_bytes=vmem_limit,
        ),
    )(x2d, w1, b1_2d, w2, b2_2d)

    return out2d.reshape(B, S, dim)


def _reference(x, w1, b1, w2, b2):
    h = jnp.einsum("bsd,dh->bsh", x, w1) + b1
    h = 0.5 * h * (1.0 + jax.lax.erf(h / jnp.sqrt(2.0)))
    return jnp.einsum("bsh,hd->bsd", h, w2) + b2


if __name__ == "__main__":
    # Small shapes consistent with FeedForward(dim, hidden_dim)
    B, S, dim, hidden_dim = 2, 8, 32, 64

    key = jax.random.PRNGKey(0)
    kx, k1, k2, k3, k4 = jax.random.split(key, 5)

    x = jax.random.normal(kx, (B, S, dim), dtype=jnp.float32)

    # Deterministic parameter init (PyTorch-style uniform(-1/sqrt(fan_in), 1/sqrt(fan_in)))
    bound1 = 1.0 / jnp.sqrt(dim)
    bound2 = 1.0 / jnp.sqrt(hidden_dim)
    w1 = jax.random.uniform(k1, (dim, hidden_dim), jnp.float32, -bound1, bound1)
    b1 = jax.random.uniform(k2, (hidden_dim,),     jnp.float32, -bound1, bound1)
    w2 = jax.random.uniform(k3, (hidden_dim, dim), jnp.float32, -bound2, bound2)
    b2 = jax.random.uniform(k4, (dim,),            jnp.float32, -bound2, bound2)

    out = feed_forward(x, w1, b1, w2, b2)
    out = jax.block_until_ready(out)

    ref = _reference(x, w1, b1, w2, b2)
    assert out.shape == (B, S, dim)
    assert jnp.allclose(out, ref, atol=1e-4, rtol=1e-4)

    print("KERNEL_OK")
</pallas_src>

<mosaic_0001>
module attributes {stable_mosaic.version = 11 : i64} {
  func.func @_ffn_kernel(%arg0: i32, %arg1: i32, %arg2: memref<16x32xf32, #tpu.memory_space<vmem>>, %arg3: memref<32x64xf32, #tpu.memory_space<vmem>>, %arg4: memref<1x64xf32, #tpu.memory_space<vmem>>, %arg5: memref<64x32xf32, #tpu.memory_space<vmem>>, %arg6: memref<1x32xf32, #tpu.memory_space<vmem>>, %arg7: memref<16x32xf32, #tpu.memory_space<vmem>>, %arg8: memref<16x32xf32, #tpu.memory_space<vmem>>) attributes {dimension_semantics = [#tpu.dimension_semantics<parallel>, #tpu.dimension_semantics<arbitrary>], iteration_bounds = array<i64: 1, 1>, scalar_prefetch = 0 : i64, scratch_operands = 1 : i64, tpu.core_type = #tpu.core_type<tc>, window_params = [{transform_indices = @transform_0, window_bounds = array<i64: 16, 32>}, {transform_indices = @transform_1, window_bounds = array<i64: 32, 64>}, {transform_indices = @transform_2, window_bounds = array<i64: 1, 64>}, {transform_indices = @transform_3, window_bounds = array<i64: 64, 32>}, {pipeline_mode = #tpu.pipeline_mode<synchronous>, transform_indices = @transform_4, window_bounds = array<i64: 1, 32>}, {transform_indices = @transform_5, window_bounds = array<i64: 16, 32>}]} {
    %c0 = arith.constant 0 : index
    %c0_0 = arith.constant 0 : index
    %0 = vector.load %arg2[%c0, %c0_0] : memref<16x32xf32, #tpu.memory_space<vmem>>, vector<16x32xf32>
    %c0_1 = arith.constant 0 : index
    %c0_2 = arith.constant 0 : index
    %1 = vector.load %arg3[%c0_1, %c0_2] : memref<32x64xf32, #tpu.memory_space<vmem>>, vector<32x64xf32>
    %cst = arith.constant dense<0.000000e+00> : vector<16x64xf32>
    %2 = tpu.matmul %0, %1, %cst {dimension_numbers = #tpu.dot_dimension_numbers<[1], [0], [0], [1], [0, 0, 1, 1], [], []>} : vector<16x32xf32>, vector<32x64xf32>, vector<16x64xf32> -> vector<16x64xf32>
    %c0_3 = arith.constant 0 : index
    %c0_4 = arith.constant 0 : index
    %3 = vector.load %arg4[%c0_3, %c0_4] : memref<1x64xf32, #tpu.memory_space<vmem>>, vector<1x64xf32>
    %4 = vector.broadcast %3 : vector<1x64xf32> to vector<16x64xf32>
    %5 = arith.addf %2, %4 : vector<16x64xf32>
    %cst_5 = arith.constant 5.000000e-01 : f32
    %6 = vector.broadcast %cst_5 : f32 to vector<16x64xf32>
    %7 = arith.mulf %6, %5 : vector<16x64xf32>
    %cst_6 = arith.constant 0.707106769 : f32
    %8 = vector.broadcast %cst_6 : f32 to vector<16x64xf32>
    %9 = arith.mulf %5, %8 : vector<16x64xf32>
    %10 = math.erf %9 : vector<16x64xf32>
    %cst_7 = arith.constant 1.000000e+00 : f32
    %11 = vector.broadcast %cst_7 : f32 to vector<16x64xf32>
    %12 = arith.addf %11, %10 : vector<16x64xf32>
    %13 = arith.mulf %7, %12 : vector<16x64xf32>
    %c0_8 = arith.constant 0 : index
    %c0_9 = arith.constant 0 : index
    %14 = vector.load %arg5[%c0_8, %c0_9] : memref<64x32xf32, #tpu.memory_space<vmem>>, vector<64x32xf32>
    %cst_10 = arith.constant dense<0.000000e+00> : vector<16x32xf32>
    %15 = tpu.matmul %13, %14, %cst_10 {dimension_numbers = #tpu.dot_dimension_numbers<[1], [0], [0], [1], [0, 0, 1, 1], [], []>} : vector<16x64xf32>, vector<64x32xf32>, vector<16x32xf32> -> vector<16x32xf32>
    %c0_i32 = arith.constant 0 : i32
    %16 = arith.cmpi eq, %arg1, %c0_i32 : i32
    %17 = arith.extui %16 : i1 to i32
    %c0_i32_11 = arith.constant 0 : i32
    %18 = arith.cmpi ne, %17, %c0_i32_11 : i32
    scf.if %18 {
      %c0_16 = arith.constant 0 : index
      %c0_17 = arith.constant 0 : index
      %25 = vector.load %arg8[%c0_16, %c0_17] : memref<16x32xf32, #tpu.memory_space<vmem>>, vector<16x32xf32>
      tpu.vector_store %arg8[%c0_16, %c0_17], %15 {strides = array<i32>} : memref<16x32xf32, #tpu.memory_space<vmem>>, vector<16x32xf32>,
    } else {
    }
    %c0_i32_12 = arith.constant 0 : i32
    %19 = arith.cmpi sgt, %arg1, %c0_i32_12 : i32
    %20 = arith.extui %19 : i1 to i32
    %c0_i32_13 = arith.constant 0 : i32
    %21 = arith.cmpi ne, %20, %c0_i32_13 : i32
    scf.if %21 {
      %c0_16 = arith.constant 0 : index
      %c0_17 = arith.constant 0 : index
      %25 = vector.load %arg8[%c0_16, %c0_17] : memref<16x32xf32, #tpu.memory_space<vmem>>, vector<16x32xf32>
      %26 = arith.addf %25, %15 : vector<16x32xf32>
      %c0_18 = arith.constant 0 : index
      %c0_19 = arith.constant 0 : index
      %27 = vector.load %arg8[%c0_18, %c0_19] : memref<16x32xf32, #tpu.memory_space<vmem>>, vector<16x32xf32>
      tpu.vector_store %arg8[%c0_18, %c0_19], %26 {strides = array<i32>} : memref<16x32xf32, #tpu.memory_space<vmem>>, vector<16x32xf32>,
    } else {
    }
    %c0_i32_14 = arith.constant 0 : i32
    %22 = arith.cmpi eq, %arg1, %c0_i32_14 : i32
    %23 = arith.extui %22 : i1 to i32
    %c0_i32_15 = arith.constant 0 : i32
    %24 = arith.cmpi ne, %23, %c0_i32_15 : i32
    scf.if %24 {
      %c0_16 = arith.constant 0 : index
      %c0_17 = arith.constant 0 : index
      %25 = vector.load %arg8[%c0_16, %c0_17] : memref<16x32xf32, #tpu.memory_space<vmem>>, vector<16x32xf32>
      %c0_18 = arith.constant 0 : index
      %c0_19 = arith.constant 0 : index
      %26 = vector.load %arg6[%c0_18, %c0_19] : memref<1x32xf32, #tpu.memory_space<vmem>>, vector<1x32xf32>
      %27 = vector.broadcast %26 : vector<1x32xf32> to vector<16x32xf32>
      %28 = arith.addf %25, %27 : vector<16x32xf32>
      %c0_20 = arith.constant 0 : index
      %c0_21 = arith.constant 0 : index
      %29 = vector.load %arg7[%c0_20, %c0_21] : memref<16x32xf32, #tpu.memory_space<vmem>>, vector<16x32xf32>
      tpu.vector_store %arg7[%c0_20, %c0_21], %28 {strides = array<i32>} : memref<16x32xf32, #tpu.memory_space<vmem>>, vector<16x32xf32>,
    } else {
    }
    return
  }
  func.func @transform_0(%arg0: i32, %arg1: i32) -> (i32, i32) {
    %c0_i32 = arith.constant 0 : i32
    %c0_i32_0 = arith.constant 0 : i32
    return %arg0, %c0_i32 : i32, i32
  }
  func.func @transform_1(%arg0: i32, %arg1: i32) -> (i32, i32) {
    %c0_i32 = arith.constant 0 : i32
    %c0_i32_0 = arith.constant 0 : i32
    return %c0_i32, %arg1 : i32, i32
  }
  func.func @transform_2(%arg0: i32, %arg1: i32) -> (i32, i32) {
    %c0_i32 = arith.constant 0 : i32
    %c0_i32_0 = arith.constant 0 : i32
    return %c0_i32, %arg1 : i32, i32
  }
  func.func @transform_3(%arg0: i32, %arg1: i32) -> (i32, i32) {
    %c0_i32 = arith.constant 0 : i32
    %c0_i32_0 = arith.constant 0 : i32
    return %arg1, %c0_i32 : i32, i32
  }
  func.func @transform_4(%arg0: i32, %arg1: i32) -> (i32, i32) {
    %c0_i32 = arith.constant 0 : i32
    %c0_i32_0 = arith.constant 0 : i32
    %c0_i32_1 = arith.constant 0 : i32
    return %c0_i32, %c0_i32_0 : i32, i32
  }
  func.func @transform_5(%arg0: i32, %arg1: i32) -> (i32, i32) {
    %c0_i32 = arith.constant 0 : i32
    %c0_i32_0 = arith.constant 0 : i32
    return %arg0, %c0_i32 : i32, i32
  }
}

</mosaic_0001>

<bundles_post_ra>
// kernel: tpu_custom_call.1
= control target key start
LH: loop header
LB: loop body
LE: loop exit
PB: predicated region body
PF: predicated region fallthrough
CT: control target
= control target key end

     0   :  { %vm34_vm0 = vcmask 261120   ;;  %s470_s0 = inlined_call_operand.vmem [shape: f32[16,32], index: 0, kind: input, shape index: {}]   ;;  %s471_s1 = inlined_call_operand.vmem [shape: f32[32,64], index: 1, kind: input, shape index: {}]   ;;  %s472_s2 = inlined_call_operand.vmem [shape: f32[1,64], index: 2, kind: input, shape index: {}]   ;;  %s473_s3 = inlined_call_operand.vmem [shape: f32[64,32], index: 3, kind: input, shape index: {}]   ;;  %s474_s4 = inlined_call_operand.vmem [shape: f32[1,32], index: 4, kind: input, shape index: {}]   ;;  %s475_s5 = inlined_call_operand.hbm [shape: f32[16,32], index: 5, kind: output, shape index: {}]  }
   0x1   :  { %v23_v0 = vld [vmem:[%s471_s1] sm:$0xff]  ;;  %v24_v1 = vld [vmem:[%s471_s1 + $0x8] sm:$0xff]  ;;  %v25_v2 = vld [vmem:[%s471_s1 + $0x10] sm:$0xff] }
   0x2   :  { %v316_v3 = vpack.c.bf16 %v24_v1, %v23_v0  ;;  %v26_v4 = vld [vmem:[%s471_s1 + $0x18] sm:$0xff]  ;;  %v21_v5 = vld [vmem:[%s470_s0] sm:$0xff] }
   0x3   :  { %v320_v6 = vpack.c.bf16 %v26_v4, %v25_v2  ;;  %294 = vmatprep.mubr.msk.f32.mxu0 %vm34_vm0, %v21_v5 }
   0x4   :  { %10 = vsyncpa [#allocation4], 0  ;;  %317 = vmatprep.subr.bf16.mxu0 %v316_v3  ;;  %v22_v7 = vld [vmem:[%s470_s0 + $0x8] sm:$0xff]  ;;  %v126_v8 = vld [vmem:[%s473_s3] sm:$0xff]  ;;  %vm134_vm1 = vcmask 523264   ;;  %s371_s21 = smov [#allocation3]  }
   0x5   :  { %319 = vmatpush3.bf16.msra.mxu0 %v316_v3  ;;  %v127_v9 = vld [vmem:[%s473_s3 + $0x8] sm:$0xff]  ;;  %v128_v11 = vld [vmem:[%s473_s3 + $0x10] sm:$0xff]  ;;  %v129_v12 = vld [vmem:[%s473_s3 + $0x18] sm:$0xff]  ;;  %s253_s22 = sshll.u32 %s371_s21, 4  ;;  %s254_s22 = int_to_ptr.vmem [resolvable:$true] %s253_s22 }
   0x6   :  { %321 = vmatprep.subr.bf16.mxu0 %v320_v6  ;;  %v324_v10 = vpack.c.bf16 %v127_v9, %v126_v8  ;;  %v328_v13 = vpack.c.bf16 %v129_v12, %v128_v11  ;;  %v130_v14 = vld [vmem:[%s473_s3 + $0x20] sm:$0xff]  ;;  %v131_v15 = vld [vmem:[%s473_s3 + $0x28] sm:$0xff]  ;;  %v132_v17 = vld [vmem:[%s473_s3 + $0x30] sm:$0xff]  ;;  %s347_s23 = scalar_lea.vmem %s254_s22, 256  ;;  %p352_p1 = scmp.lt.s32.totalorder %s254_s22, %s254_s22 }
   0x7   :  { %v332_v16 = vpack.c.bf16 %v131_v15, %v130_v14  ;;  %v133_v18 = vld [vmem:[%s473_s3 + $0x38] sm:$0xff]  ;;  %v264_v20 = vld [vmem:[%s472_s2] ss:$0 sm:$0xff]  ;;  %p348_p0 = scmp.ne.s32.totalorder %s254_s22, %s347_s23  ;;  %p353_p2 = scmp.lt.s32.totalorder %s347_s23, %s347_s23 }
   0x8   :  { %325 = vmatprep.subr.bf16.mxu1 %v324_v10  ;;  %v336_v19 = vpack.c.bf16 %v133_v18, %v132_v17  ;;  %v269_v37 = vld [vmem:[%s474_s4] ss:$0 sm:$0xff] }
   0x9   :  { %323 = vmatpush3.bf16.msra.mxu0 %v320_v6  ;;  %327 = vmatpush3.bf16.msra.mxu1 %v324_v10  ;;  %p354_p3 = por %p353_p2, %p352_p1 }
   0xa   :  { %329 = vmatprep.subr.bf16.mxu1 %v328_v13 }
   0xb   :  { %p355_p4 = pnand %p354_p3, %p348_p0 }
   0xc   :  { %295 = vmatmul.mubr.msk.f32.vlgmr.msra.gmra.mrb[0].mxu0 %vm34_vm0, %v22_v7 }
   0xd   :  { %331 = vmatpush3.bf16.msra.mxu1 %v328_v13 }
   0xe   :  { %333 = vmatprep.subr.bf16.mxu1 %v332_v16 }
  0x11   :  { %335 = vmatpush3.bf16.msra.mxu1 %v332_v16 }
  0x12   :  { %337 = vmatprep.subr.bf16.mxu1 %v336_v19 }
  0x15   :  { %339 = vmatpush3.bf16.msra.mxu1 %v336_v19 }
  0xdf   :  { %v296_v21 = vpop.f32.mrb[0].mxu0 }
  0xe0   :  { %v113_v22 = vadd.f32 %v296_v21, %v264_v20  ;;  %v107_v23 = vpop.f32.mrb[1].mxu0 }
  0xe1   :  { %v108_v24 = vadd.f32 %v264_v20, %v107_v23 }
  0xe2   :  { %v119_v25 = vmul.f32 0.70710677, %v113_v22  ;;  %v117_v32 = vmul.f32 0.5, %v113_v22 }
  0xe3   :  { %v118_v26 = vmul.f32 0.70710677, %v108_v24  ;;  %v116_v30 = vmul.f32 0.5, %v108_v24 }
  0xe4   :  { %343 = verf.f32 %v119_v25 }
  0xe5   :  { %345 = verf.f32 %v118_v26 }
  0xee   :  { %v344_v27 = vpop.eup %343 }
  0xef   :  { %v346_v28 = vpop.eup %345  ;;  %v123_v29 = vadd.f32 1.0, %v344_v27 }
  0xf0   :  { %v122_v31 = vadd.f32 1.0, %v346_v28 }
  0xf1   :  { %v125_v34 = vmul.f32 %v123_v29, %v117_v32 }
  0xf2   :  { %v124_v33 = vmul.f32 %v122_v31, %v116_v30 }
  0xf4   :  { %313 = vmatprep.mubr.msk.f32.mxu1 %vm134_vm1, %v124_v33 }
  0xf5   :  { %314 = vmatmul.mubr.msk.f32.vlgmr.msra.gmra.mrb[0].mxu1 %vm134_vm1, %v125_v34 }
 0x1c8   :  { %v315_v35 = vpop.f32.mrb[0].mxu1 }
 0x1c9   :  { %221 = vst.msk [vmem:[#allocation2 + $0x8] sm:$0xff] %vm34_vm0, %v315_v35  ;;  %v207_v36 = vpop.f32.mrb[1].mxu1 }
 0x1ca   :  { %220 = vst.msk [vmem:[#allocation2] sm:$0xff] %vm34_vm0, %v207_v36 }
 0x1d0   :  { %v236_v38 = vld [vmem:[#allocation2 + $0x8] sm:$0xff] }
 0x1d1   :  { %v235_v39 = vld [vmem:[#allocation2] sm:$0xff]  ;;  %v245_v40 = vadd.f32 %v269_v37, %v236_v38 }
 0x1d2   :  { %v244_v41 = vadd.f32 %v269_v37, %v235_v39 }
 0x1d3   :  { %247 = vst.msk [vmem:[#allocation3 + $0x8] sm:$0xff] %vm34_vm0, %v245_v40 }
 0x1d4   :  { %246 = vst.msk [vmem:[#allocation3] sm:$0xff] %vm34_vm0, %v244_v41 }
 0x1d5   :  { %358 = shalt.err (!%p355_p4)
}
 0x1d6   :  { %s359_s25 = scalar_lea.hbm %s475_s5, 256 }
 0x1d7   :  { %p360_p5 = scmp.ne.s32.totalorder %s475_s5, %s359_s25  ;;  %p363_p6 = scmp.lt.u32.totalorder %s359_s25, %s475_s5 }
 0x1d9   :  { %p365_p7 = pnand %p363_p6, %p360_p5 }
 0x1db   :  { %368 = shalt.err (!%p365_p7)
}
 0x1dc   :  { %s372_s30 = smov 128   ;;  %s373_s1 = smov 8  }
 0x1dd   :  { %259 = dma.vmem_to_hbm [thread:$0]  %s254_s22, 256, %s475_s5, [#allocation4], %s372_s30, %s372_s30, %s373_s1  }
 0x1de   :  { %369 = dma.done.wait [#allocation4], 256  }
 0x1df   :  { %370 = vsyncadd [#allocation4], 4294967040 }
 0x1e0   :  { %263 = vsyncpa [#allocation4], 1 }

</bundles_post_ra>
